<compile_context>
chip_gen: v7x
topology: tpu7x:2x2x1
jax: 0.10.0
libtpu: 0.0.40
codegen_flags: <defaults>
</compile_context>

<pallas_src>
import jax
import jax.numpy as jnp
import numpy as np
from jax.experimental import pallas as pl
from jax.experimental.pallas import tpu as pltpu


def _round_up(a, b):
    return ((a + b - 1) // b) * b


def _pick_tile(B):
    """Batch tile: one tile for small B, >=2 (even) big tiles for large B."""
    if B <= 256:
        return _round_up(max(B, 1), 8)          # block == full padded batch dim
    # multiple of 32 keeps bf16/int8 sublane tiling legal; cap 512 keeps
    # per-step VMEM (~5 MiB double-buffered) far below every generation's limit
    return min(512, _round_up((B + 1) // 2, 32))


def _additive_residual_kernel(w1_ref, x_ref, xef_ref, w2a_ref, w2b_ref,
                              bias_ref, keep_ref, out_ref):
    """One batch tile: fc1 (VPU) + fc2 (one MXU matmul) + masked softmax/L1."""
    L = x_ref.shape[1]
    EF = xef_ref.shape[1]

    # fc1: h[b, n] = sum_l w1[l] * x[b, l, n]   (L small -> VPU FMAs, w1 in SMEM)
    h = x_ref[:, 0, :] * w1_ref[0]
    for l in range(1, L):
        h = h + x_ref[:, l, :] * w1_ref[l]

    # fc2 node part: single MXU matmul, K = N.  bias row already contains
    # b2 + b1*colsum(W2a) - x_dist (folded in the wrapper).
    z = jnp.dot(h, w2a_ref[...], preferred_element_type=jnp.float32)
    z = z + bias_ref[...]

    # fc2 [emb, features] part: EF (=6) rank-1 VPU updates instead of a K=6
    # MXU pass.
    xef = xef_ref[...]
    for k in range(EF):
        z = z + xef[:, k:k + 1] * w2b_ref[k:k + 1, :]

    # Masked softmax + L1 re-normalization.  The softmax denominator cancels
    # exactly with the L1 re-norm, so only one normalization is performed.
    # (Edge case: the 1e-12 clamp applies to the unnormalized masked sum here,
    # vs. the post-softmax sum in torch; identical except when every kept
    # logit is ~27+ nats below a masked-out maximum.)
    m = jnp.max(z, axis=1, keepdims=True)
    e = jnp.exp(z - m) * keep_ref[...].astype(jnp.float32)   # keep is bf16 0/1
    denom = jnp.maximum(jnp.sum(e, axis=1, keepdims=True), 1e-12)
    out_ref[...] = e * pl.reciprocal(denom)                  # exact, per row


def additive_residual_forward(x, x_dist, x_features, x_week, x_mask, params):
    """JAX wrapper: embedding gather/concat, weight folds, Pallas kernel."""
    f32 = jnp.float32
    B, L, N = x.shape
    E = params["emb"].shape[1]
    F = x_features.shape[1]
    EF = E + F

    TB = _pick_tile(B)
    Bp = _round_up(B, TB)

    # ---- glue: embedding gather + feature concat (cheap, batch-indexed) ----
    x_emb = jnp.take(params["emb"].astype(f32), x_week, axis=0)       # (B, E)
    x_ef = jnp.concatenate([x_emb, x_features.astype(f32)], axis=1)   # (B, EF)

    # ---- weight-only folds (independent of the batch) ----------------------
    w1 = params["fc1_w"].reshape(L).astype(f32)      # fc1: Linear(L, 1)
    b1 = params["fc1_b"].reshape(()).astype(f32)
    w2 = params["fc2_w"].astype(f32)                 # (N, N+EF), torch (out,in)
    b2 = params["fc2_b"].astype(f32)                 # (N,)
    w2a = w2[:, :N].T                                # (N, N)  acts on fc1 out
    w2b = w2[:, N:].T                                # (EF, N) acts on [emb, feats]
    bias = (b2 + b1 * jnp.sum(w2a, axis=0)
            - x_dist.reshape(N).astype(f32)).reshape(1, N)

    # keep-mask: 1=keep, 0=masked; any nonzero mask value counts as masked.
    keep = (x_mask == 0).astype(jnp.bfloat16)        # (B, N) bf16 (exact 0/1)

    x_in = x.astype(f32)                             # no-op if already f32
    if Bp != B:                                      # only when B not tile-aligned
        x_in = jnp.pad(x_in, ((0, Bp - B), (0, 0), (0, 0)))
        x_ef = jnp.pad(x_ef, ((0, Bp - B), (0, 0)))
        keep = jnp.pad(keep, ((0, Bp - B), (0, 0)))

    out = pl.pallas_call(
        _additive_residual_kernel,
        out_shape=jax.ShapeDtypeStruct((Bp, N), f32),
        grid_spec=pltpu.PrefetchScalarGridSpec(
            num_scalar_prefetch=0,
            grid=(Bp // TB,),
            in_specs=[
                pl.BlockSpec(memory_space=pltpu.MemorySpace.SMEM),  # w1 (L,)
                pl.BlockSpec((TB, L, N), lambda i: (i, 0, 0)),      # x
                pl.BlockSpec((TB, EF), lambda i: (i, 0)),           # [emb, feats]
                pl.BlockSpec((N, N), lambda i: (0, 0)),             # w2a
                pl.BlockSpec((EF, N), lambda i: (0, 0)),            # w2b
                pl.BlockSpec((1, N), lambda i: (0, 0)),             # fused bias
                pl.BlockSpec((TB, N), lambda i: (i, 0)),            # keep (bf16)
            ],
            out_specs=pl.BlockSpec((TB, N), lambda i: (i, 0)),
        ),
        compiler_params=pltpu.CompilerParams(
            dimension_semantics=("parallel",)),
    )(w1, x_in, x_ef, w2a, w2b, bias, keep)

    return out[:B] if Bp != B else out


def _reference(x, x_dist, x_features, x_week, x_mask, params):
    """Pure-JAX mirror of the torch forward for correctness check."""
    B, L, N = x.shape
    out = (jnp.einsum("bln,l->bn", x, params["fc1_w"].reshape(L))
           + params["fc1_b"].reshape(()))
    x_emb = jnp.take(params["emb"], x_week, axis=0)
    x_ = jnp.concatenate([x_emb, x_features], axis=1)
    xin = jnp.concatenate([out, x_], axis=1)
    z = xin @ params["fc2_w"].T + params["fc2_b"] - x_dist[None, :]
    p = jax.nn.softmax(z, axis=1)
    p = jnp.where(x_mask.astype(bool), 0.0, p)
    denom = jnp.maximum(jnp.sum(jnp.abs(p), axis=1, keepdims=True), 1e-12)
    return p / denom


if __name__ == "__main__":
    # Small shapes consistent with the module defaults.
    B = 8     # batch rows
    N = 74    # nnodes
    E = 4     # embedding_size
    F = 2     # n_features
    NW = 7    # nweekdays
    LB = 5    # lookback_period

    key = jax.random.PRNGKey(0)
    ks = jax.random.split(key, 12)

    params = {
        "emb":   jax.random.normal(ks[0], (NW, E), jnp.float32),
        "fc1_w": jax.random.normal(ks[1], (1, LB), jnp.float32) * 0.3,
        "fc1_b": jax.random.normal(ks[2], (1,), jnp.float32) * 0.1,
        "fc2_w": jax.random.normal(ks[3], (N, N + E + F), jnp.float32) * 0.2,
        "fc2_b": jax.random.normal(ks[4], (N,), jnp.float32) * 0.1,
    }

    x          = jax.random.normal(ks[5], (B, LB, N), jnp.float32)
    x_dist     = jax.random.uniform(ks[6], (N,), jnp.float32)
    x_features = jax.random.normal(ks[7], (B, F), jnp.float32)
    x_week     = jax.random.randint(ks[8], (B,), 0, NW)
    x_mask     = (jax.random.uniform(ks[9], (B, N)) < 0.2).astype(jnp.int32)

    out = additive_residual_forward(x, x_dist, x_features, x_week, x_mask,
                                    params)
    out = jax.block_until_ready(out)

    ref = _reference(x, x_dist, x_features, x_week, x_mask, params)
    np.testing.assert_allclose(np.asarray(out), np.asarray(ref),
                               rtol=1e-5, atol=1e-5)
    print("KERNEL_OK")
</pallas_src>

<mosaic_0001>
module attributes {stable_mosaic.version = 11 : i64} {
  func.func @_additive_residual_kernel(%arg0: i32, %arg1: memref<5xf32, #tpu.memory_space<smem>>, %arg2: memref<8x5x74xf32, #tpu.memory_space<vmem>>, %arg3: memref<8x6xf32, #tpu.memory_space<vmem>>, %arg4: memref<74x74xf32, #tpu.memory_space<vmem>>, %arg5: memref<6x74xf32, #tpu.memory_space<vmem>>, %arg6: memref<1x74xf32, #tpu.memory_space<vmem>>, %arg7: memref<8x74xbf16, #tpu.memory_space<vmem>>, %arg8: memref<8x74xf32, #tpu.memory_space<vmem>>) attributes {dimension_semantics = [#tpu.dimension_semantics<parallel>], iteration_bounds = array<i64: 1>, scalar_prefetch = 0 : i64, scratch_operands = 0 : i64, tpu.core_type = #tpu.core_type<tc>, window_params = [{transform_indices = @transform_0, window_bounds = array<i64: 5>}, {transform_indices = @transform_1, window_bounds = array<i64: 8, 5, 74>}, {transform_indices = @transform_2, window_bounds = array<i64: 8, 6>}, {pipeline_mode = #tpu.pipeline_mode<synchronous>, transform_indices = @transform_3, window_bounds = array<i64: 74, 74>}, {pipeline_mode = #tpu.pipeline_mode<synchronous>, transform_indices = @transform_4, window_bounds = array<i64: 6, 74>}, {pipeline_mode = #tpu.pipeline_mode<synchronous>, transform_indices = @transform_5, window_bounds = array<i64: 1, 74>}, {transform_indices = @transform_6, window_bounds = array<i64: 8, 74>}, {transform_indices = @transform_7, window_bounds = array<i64: 8, 74>}]} {
    %c0 = arith.constant 0 : index
    %c0_0 = arith.constant 0 : index
    %c0_1 = arith.constant 0 : index
    %0 = vector.load %arg2[%c0, %c0_0, %c0_1] : memref<8x5x74xf32, #tpu.memory_space<vmem>>, vector<8x1x74xf32>
    %1 = vector.shape_cast %0 : vector<8x1x74xf32> to vector<8x74xf32>
    %c0_2 = arith.constant 0 : index
    %2 = memref.load %arg1[%c0_2] : memref<5xf32, #tpu.memory_space<smem>>
    %3 = vector.broadcast %2 : f32 to vector<8x74xf32>
    %4 = arith.mulf %1, %3 : vector<8x74xf32>
    %c0_3 = arith.constant 0 : index
    %c1 = arith.constant 1 : index
    %c0_4 = arith.constant 0 : index
    %5 = vector.load %arg2[%c0_3, %c1, %c0_4] : memref<8x5x74xf32, #tpu.memory_space<vmem>>, vector<8x1x74xf32>
    %6 = vector.shape_cast %5 : vector<8x1x74xf32> to vector<8x74xf32>
    %c1_5 = arith.constant 1 : index
    %7 = memref.load %arg1[%c1_5] : memref<5xf32, #tpu.memory_space<smem>>
    %8 = vector.broadcast %7 : f32 to vector<8x74xf32>
    %9 = arith.mulf %6, %8 : vector<8x74xf32>
    %10 = arith.addf %4, %9 : vector<8x74xf32>
    %c0_6 = arith.constant 0 : index
    %c2 = arith.constant 2 : index
    %c0_7 = arith.constant 0 : index
    %11 = vector.load %arg2[%c0_6, %c2, %c0_7] : memref<8x5x74xf32, #tpu.memory_space<vmem>>, vector<8x1x74xf32>
    %12 = vector.shape_cast %11 : vector<8x1x74xf32> to vector<8x74xf32>
    %c2_8 = arith.constant 2 : index
    %13 = memref.load %arg1[%c2_8] : memref<5xf32, #tpu.memory_space<smem>>
    %14 = vector.broadcast %13 : f32 to vector<8x74xf32>
    %15 = arith.mulf %12, %14 : vector<8x74xf32>
    %16 = arith.addf %10, %15 : vector<8x74xf32>
    %c0_9 = arith.constant 0 : index
    %c3 = arith.constant 3 : index
    %c0_10 = arith.constant 0 : index
    %17 = vector.load %arg2[%c0_9, %c3, %c0_10] : memref<8x5x74xf32, #tpu.memory_space<vmem>>, vector<8x1x74xf32>
    %18 = vector.shape_cast %17 : vector<8x1x74xf32> to vector<8x74xf32>
    %c3_11 = arith.constant 3 : index
    %19 = memref.load %arg1[%c3_11] : memref<5xf32, #tpu.memory_space<smem>>
    %20 = vector.broadcast %19 : f32 to vector<8x74xf32>
    %21 = arith.mulf %18, %20 : vector<8x74xf32>
    %22 = arith.addf %16, %21 : vector<8x74xf32>
    %c0_12 = arith.constant 0 : index
    %c4 = arith.constant 4 : index
    %c0_13 = arith.constant 0 : index
    %23 = vector.load %arg2[%c0_12, %c4, %c0_13] : memref<8x5x74xf32, #tpu.memory_space<vmem>>, vector<8x1x74xf32>
    %24 = vector.shape_cast %23 : vector<8x1x74xf32> to vector<8x74xf32>
    %c4_14 = arith.constant 4 : index
    %25 = memref.load %arg1[%c4_14] : memref<5xf32, #tpu.memory_space<smem>>
    %26 = vector.broadcast %25 : f32 to vector<8x74xf32>
    %27 = arith.mulf %24, %26 : vector<8x74xf32>
    %28 = arith.addf %22, %27 : vector<8x74xf32>
    %c0_15 = arith.constant 0 : index
    %c0_16 = arith.constant 0 : index
    %29 = vector.load %arg4[%c0_15, %c0_16] : memref<74x74xf32, #tpu.memory_space<vmem>>, vector<74x74xf32>
    %cst = arith.constant dense<0.000000e+00> : vector<8x74xf32>
    %30 = tpu.matmul %28, %29, %cst {dimension_numbers = #tpu.dot_dimension_numbers<[1], [0], [0], [1], [0, 0, 1, 1], [], []>} : vector<8x74xf32>, vector<74x74xf32>, vector<8x74xf32> -> vector<8x74xf32>
    %c0_17 = arith.constant 0 : index
    %c0_18 = arith.constant 0 : index
    %31 = vector.load %arg6[%c0_17, %c0_18] : memref<1x74xf32, #tpu.memory_space<vmem>>, vector<1x74xf32>
    %32 = vector.broadcast %31 : vector<1x74xf32> to vector<8x74xf32>
    %33 = arith.addf %30, %32 : vector<8x74xf32>
    %c0_19 = arith.constant 0 : index
    %c0_20 = arith.constant 0 : index
    %34 = vector.load %arg3[%c0_19, %c0_20] : memref<8x6xf32, #tpu.memory_space<vmem>>, vector<8x6xf32>
    %35 = vector.extract_strided_slice %34 {offsets = [0, 0], sizes = [8, 1], strides = [1, 1]} : vector<8x6xf32> to vector<8x1xf32>
    %c0_21 = arith.constant 0 : index
    %c0_22 = arith.constant 0 : index
    %36 = vector.load %arg5[%c0_21, %c0_22] : memref<6x74xf32, #tpu.memory_space<vmem>>, vector<1x74xf32>
    %37 = vector.broadcast %35 : vector<8x1xf32> to vector<8x74xf32>
    %38 = vector.broadcast %36 : vector<1x74xf32> to vector<8x74xf32>
    %39 = arith.mulf %37, %38 : vector<8x74xf32>
    %40 = arith.addf %33, %39 : vector<8x74xf32>
    %41 = vector.extract_strided_slice %34 {offsets = [0, 1], sizes = [8, 1], strides = [1, 1]} : vector<8x6xf32> to vector<8x1xf32>
    %c1_23 = arith.constant 1 : index
    %c0_24 = arith.constant 0 : index
    %42 = vector.load %arg5[%c1_23, %c0_24] : memref<6x74xf32, #tpu.memory_space<vmem>>, vector<1x74xf32>
    %43 = vector.broadcast %41 : vector<8x1xf32> to vector<8x74xf32>
    %44 = vector.broadcast %42 : vector<1x74xf32> to vector<8x74xf32>
    %45 = arith.mulf %43, %44 : vector<8x74xf32>
    %46 = arith.addf %40, %45 : vector<8x74xf32>
    %47 = vector.extract_strided_slice %34 {offsets = [0, 2], sizes = [8, 1], strides = [1, 1]} : vector<8x6xf32> to vector<8x1xf32>
    %c2_25 = arith.constant 2 : index
    %c0_26 = arith.constant 0 : index
    %48 = vector.load %arg5[%c2_25, %c0_26] : memref<6x74xf32, #tpu.memory_space<vmem>>, vector<1x74xf32>
    %49 = vector.broadcast %47 : vector<8x1xf32> to vector<8x74xf32>
    %50 = vector.broadcast %48 : vector<1x74xf32> to vector<8x74xf32>
    %51 = arith.mulf %49, %50 : vector<8x74xf32>
    %52 = arith.addf %46, %51 : vector<8x74xf32>
    %53 = vector.extract_strided_slice %34 {offsets = [0, 3], sizes = [8, 1], strides = [1, 1]} : vector<8x6xf32> to vector<8x1xf32>
    %c3_27 = arith.constant 3 : index
    %c0_28 = arith.constant 0 : index
    %54 = vector.load %arg5[%c3_27, %c0_28] : memref<6x74xf32, #tpu.memory_space<vmem>>, vector<1x74xf32>
    %55 = vector.broadcast %53 : vector<8x1xf32> to vector<8x74xf32>
    %56 = vector.broadcast %54 : vector<1x74xf32> to vector<8x74xf32>
    %57 = arith.mulf %55, %56 : vector<8x74xf32>
    %58 = arith.addf %52, %57 : vector<8x74xf32>
    %59 = vector.extract_strided_slice %34 {offsets = [0, 4], sizes = [8, 1], strides = [1, 1]} : vector<8x6xf32> to vector<8x1xf32>
    %c4_29 = arith.constant 4 : index
    %c0_30 = arith.constant 0 : index
    %60 = vector.load %arg5[%c4_29, %c0_30] : memref<6x74xf32, #tpu.memory_space<vmem>>, vector<1x74xf32>
    %61 = vector.broadcast %59 : vector<8x1xf32> to vector<8x74xf32>
    %62 = vector.broadcast %60 : vector<1x74xf32> to vector<8x74xf32>
    %63 = arith.mulf %61, %62 : vector<8x74xf32>
    %64 = arith.addf %58, %63 : vector<8x74xf32>
    %65 = vector.extract_strided_slice %34 {offsets = [0, 5], sizes = [8, 1], strides = [1, 1]} : vector<8x6xf32> to vector<8x1xf32>
    %c5 = arith.constant 5 : index
    %c0_31 = arith.constant 0 : index
    %66 = vector.load %arg5[%c5, %c0_31] : memref<6x74xf32, #tpu.memory_space<vmem>>, vector<1x74xf32>
    %67 = vector.broadcast %65 : vector<8x1xf32> to vector<8x74xf32>
    %68 = vector.broadcast %66 : vector<1x74xf32> to vector<8x74xf32>
    %69 = arith.mulf %67, %68 : vector<8x74xf32>
    %70 = arith.addf %64, %69 : vector<8x74xf32>
    %cst_32 = arith.constant dense<0xFF800000> : vector<8xf32>
    %71 = vector.multi_reduction <maximumf>, %70, %cst_32 [1] : vector<8x74xf32> to vector<8xf32>
    %72 = vector.shape_cast %71 : vector<8xf32> to vector<8x1xf32>
    %73 = vector.broadcast %72 : vector<8x1xf32> to vector<8x74xf32>
    %74 = arith.subf %70, %73 : vector<8x74xf32>
    %75 = math.exp %74 : vector<8x74xf32>
    %c0_33 = arith.constant 0 : index
    %c0_34 = arith.constant 0 : index
    %76 = vector.load %arg7[%c0_33, %c0_34] : memref<8x74xbf16, #tpu.memory_space<vmem>>, vector<8x74xbf16>
    %77 = arith.extf %76 : vector<8x74xbf16> to vector<8x74xf32>
    %78 = arith.mulf %75, %77 : vector<8x74xf32>
    %cst_35 = arith.constant dense<0.000000e+00> : vector<8xf32>
    %79 = vector.multi_reduction <add>, %78, %cst_35 [1] : vector<8x74xf32> to vector<8xf32>
    %80 = vector.shape_cast %79 : vector<8xf32> to vector<8x1xf32>
    %cst_36 = arith.constant 9.99999996E-13 : f32
    %81 = vector.broadcast %cst_36 : f32 to vector<8x1xf32>
    %82 = arith.maximumf %80, %81 : vector<8x1xf32>
    %83 = tpu.reciprocal %82 : vector<8x1xf32> -> vector<8x1xf32>
    %84 = vector.broadcast %83 : vector<8x1xf32> to vector<8x74xf32>
    %85 = arith.mulf %78, %84 : vector<8x74xf32>
    %c0_37 = arith.constant 0 : index
    %c0_38 = arith.constant 0 : index
    %86 = vector.load %arg8[%c0_37, %c0_38] : memref<8x74xf32, #tpu.memory_space<vmem>>, vector<8x74xf32>
    tpu.vector_store %arg8[%c0_37, %c0_38], %85 {strides = array<i32>} : memref<8x74xf32, #tpu.memory_space<vmem>>, vector<8x74xf32>,
    return
  }
  func.func @transform_0(%arg0: i32) -> i32 {
    %c0_i32 = arith.constant 0 : i32
    %c0_i32_0 = arith.constant 0 : i32
    return %c0_i32 : i32
  }
  func.func @transform_1(%arg0: i32) -> (i32, i32, i32) {
    %c0_i32 = arith.constant 0 : i32
    %c0_i32_0 = arith.constant 0 : i32
    %c0_i32_1 = arith.constant 0 : i32
    return %arg0, %c0_i32, %c0_i32_0 : i32, i32, i32
  }
  func.func @transform_2(%arg0: i32) -> (i32, i32) {
    %c0_i32 = arith.constant 0 : i32
    %c0_i32_0 = arith.constant 0 : i32
    return %arg0, %c0_i32 : i32, i32
  }
  func.func @transform_3(%arg0: i32) -> (i32, i32) {
    %c0_i32 = arith.constant 0 : i32
    %c0_i32_0 = arith.constant 0 : i32
    %c0_i32_1 = arith.constant 0 : i32
    return %c0_i32, %c0_i32_0 : i32, i32
  }
  func.func @transform_4(%arg0: i32) -> (i32, i32) {
    %c0_i32 = arith.constant 0 : i32
    %c0_i32_0 = arith.constant 0 : i32
    %c0_i32_1 = arith.constant 0 : i32
    return %c0_i32, %c0_i32_0 : i32, i32
  }
  func.func @transform_5(%arg0: i32) -> (i32, i32) {
    %c0_i32 = arith.constant 0 : i32
    %c0_i32_0 = arith.constant 0 : i32
    %c0_i32_1 = arith.constant 0 : i32
    return %c0_i32, %c0_i32_0 : i32, i32
  }
  func.func @transform_6(%arg0: i32) -> (i32, i32) {
    %c0_i32 = arith.constant 0 : i32
    %c0_i32_0 = arith.constant 0 : i32
    return %arg0, %c0_i32 : i32, i32
  }
  func.func @transform_7(%arg0: i32) -> (i32, i32) {
    %c0_i32 = arith.constant 0 : i32
    %c0_i32_0 = arith.constant 0 : i32
    return %arg0, %c0_i32 : i32, i32
  }
}

</mosaic_0001>

<bundles_post_ra>
// kernel: tpu_custom_call.1
= control target key start
LH: loop header
LB: loop body
LE: loop exit
PB: predicated region body
PF: predicated region fallthrough
CT: control target
= control target key end

     0   :  { %12 = vsyncpa [#allocation4], 0  ;;  %s781_s0 = inlined_call_operand.vmem [shape: f32[5], index: 0, kind: input, shape index: {}]   ;;  %s782_s1 = inlined_call_operand.vmem [shape: f32[8,5,74], index: 1, kind: input, shape index: {}]   ;;  %s783_s2 = inlined_call_operand.vmem [shape: f32[8,6], index: 2, kind: input, shape index: {}]   ;;  %s784_s3 = inlined_call_operand.vmem [shape: f32[74,74], index: 3, kind: input, shape index: {}]   ;;  %s785_s4 = inlined_call_operand.vmem [shape: f32[6,74], index: 4, kind: input, shape index: {}]   ;;  %s786_s5 = inlined_call_operand.vmem [shape: f32[1,74], index: 5, kind: input, shape index: {}]   ;;  %s787_s6 = inlined_call_operand.vmem [shape: bf16[8,74], index: 6, kind: input, shape index: {}]   ;;  %s788_s7 = inlined_call_operand.hbm [shape: f32[8,74], index: 7, kind: output, shape index: {}]  }
   0x1   :  { %13 = vsyncpa [#allocation3], 0  ;;  %s20_s26 = sshll.u32 %s781_s0, 4  ;;  %s21_s26 = int_to_ptr.vmem [resolvable:$true] %s20_s26 }
   0x2   :  { %s469_s27 = scalar_lea.vmem %s21_s26, 16  ;;  %p474_p1 = scmp.lt.s32.totalorder %s21_s26, %s21_s26 }
   0x3   :  { %p470_p0 = scmp.ne.s32.totalorder %s21_s26, %s469_s27  ;;  %p475_p2 = scmp.lt.s32.totalorder %s469_s27, %s469_s27 }
   0x5   :  { %p476_p3 = por %p475_p2, %p474_p1 }
   0x7   :  { %p477_p4 = pnand %p476_p3, %p470_p0 }
   0x9   :  { %480 = shalt.err (!%p477_p4)
}
   0xa   :  { %s507_s28 = smov [#allocation2]  }
   0xb   :  { %23 = dma.vmem_to_smem %s21_s26, 16, %s507_s28, [#allocation4]  }
   0xc   :  { %503 = dma.done.wait [#allocation4], 16  }
   0xd   :  { %504 = vsyncadd [#allocation4], 4294967280 }
   0xe   :  { %39 = sfence }
   0xf   :  { %v162_v0 = vld [vmem:[%s784_s3] sm:$0xff]  ;;  %v163_v1 = vld [vmem:[%s784_s3 + $0x8] sm:$0xff]  ;;  %v164_v2 = vld [vmem:[%s784_s3 + $0x10] sm:$0xff]  ;;  %v508_v3 = vmov 0.0|0.0   ;;  %vm509_vm0 = vmmov 0   ;;  %v510_v6 = vmov 0.0  }
  0x10   :  { %431 = vmatprep.subr.bf16.mxu0 %v508_v3  ;;  %v432_v4 = vpack.c.bf16 %v163_v1, %v162_v0  ;;  %v165_v5 = vld [vmem:[%s784_s3 + $0x18] sm:$0xff]  ;;  %428 = vmatprep.mubr.msk.f32.mxu0 %vm509_vm0, %v510_v6  ;;  %s48_s13 = sld [smem:[#allocation2]]  ;;  %s575_s14 = sld [smem:[#allocation2 + $0x1]]  ;;  %v166_v8 = vld [vmem:[%s784_s3 + $0x20] sm:$0xff]  ;;  %v167_v9 = vld [vmem:[%s784_s3 + $0x28] sm:$0xff]  ;;  %vm211_vm1 = vcmask 1041408  }
  0x11   :  { %v435_v7 = vpack.c.bf16 %v165_v5, %v164_v2  ;;  %v168_v10 = vld [vmem:[%s784_s3 + $0x30] sm:$0xff]  ;;  %v169_v11 = vld [vmem:[%s784_s3 + $0x38] sm:$0xff]  ;;  %v40_v12 = vld [vmem:[%s782_s1] sm:$0x1]  ;;  %v438_v16 = vpack.c.bf16 %v167_v9, %v166_v8  ;;  %s640_s9 = sld [smem:[#allocation2 + $0x2]]  ;;  %vm511_vm2 = vmmov 1  }
  0x12   :  { %433 = vmatpush3.bf16.msra.mxu0 %v432_v4  ;;  %v41_v13 = vld [vmem:[%s782_s1 + $0x8] sm:$0x1]  ;;  %v42_v14 = vld [vmem:[%s782_s1 + $0x10] sm:$0x1]  ;;  %v43_v15 = vld [vmem:[%s782_s1 + $0x18] sm:$0x1]  ;;  %v441_v24 = vpack.c.bf16 %v169_v11, %v168_v10 }
  0x13   :  { %434 = vmatprep.subr.bf16.mxu0 %v508_v3  ;;  %v44_v17 = vld [vmem:[%s782_s1 + $0x20] sm:$0x1]  ;;  %v45_v18 = vld [vmem:[%s782_s1 + $0x28] sm:$0x1]  ;;  %v46_v19 = vld [vmem:[%s782_s1 + $0x30] sm:$0x1] }
  0x14   :  { %v47_v20 = vld [vmem:[%s782_s1 + $0x38] sm:$0x1]  ;;  %v58_v22 = vld [vmem:[%s782_s1 + $0x1] sm:$0x1]  ;;  %v59_v23 = vld [vmem:[%s782_s1 + $0x9] sm:$0x1] }
  0x15   :  { %v60_v26 = vld [vmem:[%s782_s1 + $0x11] sm:$0x1]  ;;  %v61_v27 = vld [vmem:[%s782_s1 + $0x19] sm:$0x1]  ;;  %v62_v28 = vld [vmem:[%s782_s1 + $0x21] sm:$0x1] }
  0x16   :  { %436 = vmatpush3.bf16.msra.mxu0 %v435_v7  ;;  %v49_v21 = vstv %s48_s13  ;;  %v63_v33 = vld [vmem:[%s782_s1 + $0x29] sm:$0x1]  ;;  %v64_v34 = vld [vmem:[%s782_s1 + $0x31] sm:$0x1]  ;;  %v65_v35 = vld [vmem:[%s782_s1 + $0x39] sm:$0x1] }
  0x17   :  { %437 = vmatprep.subr.bf16.mxu0 %v508_v3  ;;  %v50_v25 = vmul.f32 %v49_v21, %v40_v12  ;;  %v51_v29 = vmul.f32 %v49_v21, %v41_v13  ;;  %v52_v30 = vmul.f32 %v49_v21, %v42_v14  ;;  %v53_v31 = vmul.f32 %v49_v21, %v43_v15  ;;  %v170_v40 = vld [vmem:[%s784_s3 + $0x40] sm:$0xff]  ;;  %v171_v41 = vld [vmem:[%s784_s3 + $0x48] sm:$0x3]  ;;  %vm650_vm3 = vmpackc.low %vm211_vm1, %vm511_vm2  ;;  %s660_s17 = sld [smem:[#allocation2 + $0x3]] }
  0x18   :  { %v54_v32 = vmul.f32 %v49_v21, %v44_v17  ;;  %v55_v36 = vmul.f32 %v49_v21, %v45_v18  ;;  %v56_v37 = vmul.f32 %v49_v21, %v46_v19  ;;  %v57_v38 = vmul.f32 %v49_v21, %v47_v20  ;;  %v84_v51 = vld [vmem:[%s782_s1 + $0x2] sm:$0x1]  ;;  %v85_v52 = vld [vmem:[%s782_s1 + $0xa] sm:$0x1]  ;;  %v86_v55 = vld [vmem:[%s782_s1 + $0x12] sm:$0x1] }
  0x19   :  { %v67_v39 = vstv %s575_s14  ;;  %v444_v53 = vpack.c.bf16 %v171_v41, %v170_v40  ;;  %v87_v56 = vld [vmem:[%s782_s1 + $0x1a] sm:$0x1]  ;;  %v88_v57 = vld [vmem:[%s782_s1 + $0x22] sm:$0x1]  ;;  %v89_v62 = vld [vmem:[%s782_s1 + $0x2a] sm:$0x1] }
  0x1a   :  { %439 = vmatpush3.bf16.msra.mxu0 %v438_v16  ;;  %v68_v42 = vmul.f32 %v67_v39, %v58_v22  ;;  %v69_v43 = vmul.f32 %v67_v39, %v59_v23  ;;  %v70_v44 = vmul.f32 %v67_v39, %v60_v26  ;;  %v71_v45 = vmul.f32 %v67_v39, %v61_v27  ;;  %v90_v63 = vld [vmem:[%s782_s1 + $0x32] sm:$0x1]  ;;  %v91_v0 = vld [vmem:[%s782_s1 + $0x3a] sm:$0x1]  ;;  %v110_v13 = vld [vmem:[%s782_s1 + $0x3] sm:$0x1] }
  0x1b   :  { %440 = vmatprep.subr.bf16.mxu0 %v508_v3  ;;  %v72_v46 = vmul.f32 %v67_v39, %v62_v28  ;;  %v73_v47 = vmul.f32 %v67_v39, %v63_v33  ;;  %v74_v48 = vmul.f32 %v67_v39, %v64_v34  ;;  %v75_v49 = vmul.f32 %v67_v39, %v65_v35  ;;  %v111_v14 = vld [vmem:[%s782_s1 + $0xb] sm:$0x1]  ;;  %v112_v16 = vld [vmem:[%s782_s1 + $0x13] sm:$0x1]  ;;  %v113_v17 = vld [vmem:[%s782_s1 + $0x1b] sm:$0x1] }
  0x1c   :  { %v76_v54 = vadd.f32 %v68_v42, %v50_v25  ;;  %v77_v58 = vadd.f32 %v69_v43, %v51_v29  ;;  %v78_v59 = vadd.f32 %v70_v44, %v52_v30  ;;  %v79_v60 = vadd.f32 %v71_v45, %v53_v31  ;;  %v114_v18 = vld [vmem:[%s782_s1 + $0x23] sm:$0x1]  ;;  %v115_v23 = vld [vmem:[%s782_s1 + $0x2b] sm:$0x1]  ;;  %v117_v25 = vld [vmem:[%s782_s1 + $0x3b] sm:$0x1] }
  0x1d   :  { %v80_v61 = vadd.f32 %v72_v46, %v54_v32  ;;  %v81_v1 = vadd.f32 %v73_v47, %v55_v36  ;;  %v82_v2 = vadd.f32 %v74_v48, %v56_v37  ;;  %v83_v4 = vadd.f32 %v75_v49, %v57_v38  ;;  %v136_v38 = vld [vmem:[%s782_s1 + $0x4] sm:$0x1]  ;;  %v137_v39 = vld [vmem:[%s782_s1 + $0xc] sm:$0x1]  ;;  %v138_v41 = vld [vmem:[%s782_s1 + $0x14] sm:$0x1] }
  0x1e   :  { %442 = vmatpush3.bf16.msra.mxu0 %v441_v24  ;;  %v116_v24 = vld [vmem:[%s782_s1 + $0x33] sm:$0x1]  ;;  %v119_v29 = vstv %s660_s17  ;;  %vm188_vm4 = vcmask 1041409   ;;  %vm191_vm5 = vcmask 1042434   ;;  %v139_v42 = vld [vmem:[%s782_s1 + $0x1c] sm:$0x1] }
  0x1f   :  { %443 = vmatprep.subr.bf16.mxu0 %v508_v3  ;;  %v93_v3 = vstv %s640_s9  ;;  %s690_s9 = sld [smem:[#allocation2 + $0x4]]  ;;  %v120_v30 = vmul.f32 %v119_v29, %v110_v13  ;;  %v121_v31 = vmul.f32 %v119_v29, %v111_v14  ;;  %v122_v32 = vmul.f32 %v119_v29, %v112_v16  ;;  %v140_v43 = vld [vmem:[%s782_s1 + $0x24] sm:$0x1]  ;;  %v141_v48 = vld [vmem:[%s782_s1 + $0x2c] sm:$0x1] }
  0x20   :  { %v94_v5 = vmul.f32 %v93_v3, %v84_v51  ;;  %v95_v6 = vmul.f32 %v93_v3, %v85_v52  ;;  %v96_v7 = vmul.f32 %v93_v3, %v86_v55  ;;  %v97_v8 = vmul.f32 %v93_v3, %v87_v56  ;;  %v142_v49 = vld [vmem:[%s782_s1 + $0x34] sm:$0x1]  ;;  %v143_v50 = vld [vmem:[%s782_s1 + $0x3c] sm:$0x1] }
  0x21   :  { %v98_v9 = vmul.f32 %v93_v3, %v88_v57  ;;  %v99_v10 = vmul.f32 %v93_v3, %v89_v62  ;;  %v100_v11 = vmul.f32 %v93_v3, %v90_v63  ;;  %v101_v12 = vmul.f32 %v93_v3, %v91_v0 }
  0x22   :  { %446 = vmatpush3.bf16.msk.msra.mxu0 %vm650_vm3, %v444_v53  ;;  %v102_v15 = vadd.f32 %v94_v5, %v76_v54  ;;  %v103_v19 = vadd.f32 %v95_v6, %v77_v58  ;;  %v104_v20 = vadd.f32 %v96_v7, %v78_v59  ;;  %v105_v21 = vadd.f32 %v97_v8, %v79_v60  ;;  %v285_v7 = vld [vmem:[%s783_s2] sm:$0xff] }
  0x23   :  { %v106_v22 = vadd.f32 %v98_v9, %v80_v61  ;;  %v107_v26 = vadd.f32 %v99_v10, %v81_v1  ;;  %v108_v27 = vadd.f32 %v100_v11, %v82_v2  ;;  %v109_v28 = vadd.f32 %v101_v12, %v83_v4 }
  0x24   :  { %v123_v33 = vmul.f32 %v119_v29, %v113_v17  ;;  %v124_v34 = vmul.f32 %v119_v29, %v114_v18  ;;  %v125_v35 = vmul.f32 %v119_v29, %v115_v23  ;;  %v126_v36 = vmul.f32 %v119_v29, %v116_v24 }
  0x25   :  { %v127_v37 = vmul.f32 %v119_v29, %v117_v25  ;;  %v128_v40 = vadd.f32 %v120_v30, %v102_v15  ;;  %v129_v44 = vadd.f32 %v121_v31, %v103_v19  ;;  %v130_v45 = vadd.f32 %v122_v32, %v104_v20  ;;  %v391_v30 = vld [vmem:[%s785_s4] ss:$0 sm:$0xff]  ;;  %v392_v32 = vld [vmem:[%s785_s4 + $0x1] ss:$0 sm:$0xff] }
  0x26   :  { %v131_v46 = vadd.f32 %v123_v33, %v105_v21  ;;  %v132_v47 = vadd.f32 %v124_v34, %v106_v22  ;;  %v133_v51 = vadd.f32 %v125_v35, %v107_v26  ;;  %v134_v52 = vadd.f32 %v126_v36, %v108_v27  ;;  %v388_v31 = vld [vmem:[%s786_s5] ss:$0 sm:$0xff] }
  0x27   :  { %v135_v53 = vadd.f32 %v127_v37, %v109_v28  ;;  %v145_v54 = vstv %s690_s9  ;;  %vm194_vm6 = vcmask 1043459   ;;  %v512_v12 = vmov 0  }
  0x28   :  { %v146_v55 = vmul.f32 %v145_v54, %v136_v38  ;;  %v147_v56 = vmul.f32 %v145_v54, %v137_v39  ;;  %v148_v57 = vmul.f32 %v145_v54, %v138_v41  ;;  %v149_v58 = vmul.f32 %v145_v54, %v139_v42  ;;  %459 = vset.pattern.permute.xlu0 %v512_v12  ;;  %v394_v42 = vld [vmem:[%s785_s4 + $0x3] ss:$0 sm:$0xff] }
  0x29   :  { %v150_v59 = vmul.f32 %v145_v54, %v140_v43  ;;  %v151_v60 = vmul.f32 %v145_v54, %v141_v48  ;;  %v152_v61 = vmul.f32 %v145_v54, %v142_v49  ;;  %v153_v62 = vmul.f32 %v145_v54, %v143_v50  ;;  %289 = vperm.xlu0 %459, %v285_v7   ;;  %v395_v43 = vld [vmem:[%s785_s4 + $0x4] ss:$0 sm:$0xff] }
  0x2a   :  { %v154_v63 = vadd.f32 %v146_v55, %v128_v40  ;;  %v155_v0 = vadd.f32 %v147_v56, %v129_v44  ;;  %v156_v1 = vadd.f32 %v148_v57, %v130_v45  ;;  %v157_v2 = vadd.f32 %v149_v58, %v131_v46  ;;  %v393_v40 = vld [vmem:[%s785_s4 + $0x2] ss:$0 sm:$0xff] }
  0x2b   :  { %v158_v4 = vadd.f32 %v150_v59, %v132_v47  ;;  %v159_v3 = vadd.f32 %v151_v60, %v133_v51  ;;  %v160_v5 = vadd.f32 %v152_v61, %v134_v52  ;;  %v161_v6 = vadd.f32 %v153_v62, %v135_v53  ;;  %v396_v47 = vld [vmem:[%s785_s4 + $0x5] ss:$0 sm:$0xff]  ;;  %v359_v60 = vld [vmem:[%s787_s6] sm:$0xf]  ;;  %s518_s4 = smov [#allocation5]  }
  0x2c   :  { %v187_v8 = vrot.slane %v155_v0, 7  ;;  %v190_v9 = vrot.slane %v156_v1, 6  ;;  %v193_v10 = vrot.slane %v157_v2, 5  ;;  %vm197_vm7 = vcmask 1044484   ;;  %s375_s27 = sshll.u32 %s518_s4, 4  ;;  %s376_s27 = int_to_ptr.vmem [resolvable:$true] %s375_s27 }
  0x2d   :  { %v196_v11 = vrot.slane %v158_v4, 4  ;;  %v199_v14 = vrot.slane %v159_v3, 3  ;;  %vm200_vm8 = vcmask 1045509   ;;  %v202_v16 = vrot.slane %v160_v5, 2  ;;  %s481_s28 = scalar_lea.vmem %s376_s27, 128  ;;  %p486_p6 = scmp.lt.s32.totalorder %s376_s27, %s376_s27 }
  0x2e   :  { %v189_v13 = vsel %vm188_vm4, %v187_v8, %v154_v63  ;;  %v513_v17 = vmov 2   ;;  %vm203_vm9 = vcmask 1046534   ;;  %v205_v19 = vrot.slane %v161_v6, 1  ;;  %p482_p5 = scmp.ne.s32.totalorder %s376_s27, %s481_s28  ;;  %p487_p7 = scmp.lt.s32.totalorder %s481_s28, %s481_s28 }
  0x2f   :  { %v192_v15 = vsel %vm191_vm5, %v190_v9, %v189_v13  ;;  %461 = vset.pattern.permute.xlu1 %v513_v17  ;;  %vm206_vm10 = vcmask 1047559   ;;  %vm208_vm11 = vcmask 605184   ;;  %v514_v22 = vmov 1  }
  0x30   :  { %v195_v18 = vsel %vm194_vm6, %v193_v10, %v192_v15  ;;  %311 = vperm.xlu1 %461, %v285_v7   ;;  %460 = vset.pattern.permute.xlu0 %v514_v22  ;;  %v515_v25 = vmov 3   ;;  %v516_v26 = vmov 5   ;;  %v517_v27 = vmov 4   ;;  %p488_p8 = por %p487_p7, %p486_p6 }
  0x31   :  { %v198_v20 = vsel %vm197_vm7, %v196_v11, %v195_v18  ;;  %300 = vperm.xlu0 %460, %v285_v7   ;;  %v360_v61 = vunpack.c.l.bf16 %v359_v60 }
  0x32   :  { %v201_v21 = vsel %vm200_vm8, %v199_v14, %v198_v20  ;;  %p489_p9 = pnand %p488_p8, %p482_p5 }
  0x33   :  { %v204_v23 = vsel %vm203_vm9, %v202_v16, %v201_v21 }
  0x34   :  { %v207_v24 = vsel %vm206_vm10, %v205_v19, %v204_v23  ;;  %462 = vset.pattern.permute.xlu1 %v515_v25 }
  0x35   :  { %429 = vmatmul.mubr.msk.f32.vlgmr.msra.gmra.mrb[0].mxu0 %vm208_vm11, %v207_v24  ;;  %322 = vperm.xlu1 %462, %v285_v7  }
  0x36   :  { %464 = vset.pattern.permute.xlu0 %v516_v26 }
  0x37   :  { %344 = vperm.xlu0 %464, %v285_v7  }
  0x39   :  { %463 = vset.pattern.permute.xlu1 %v517_v27 }
  0x3a   :  { %333 = vperm.xlu1 %463, %v285_v7  }
  0xa8   :  { %v290_v28 = vpop.permute.xlu0 %289 }
  0xa9   :  { %v296_v36 = vmul.f32 %v391_v30, %v290_v28 }
  0xaf   :  { %v312_v29 = vpop.permute.xlu1 %311 }
  0xb0   :  { %v301_v33 = vpop.permute.xlu0 %300  ;;  %v318_v45 = vmul.f32 %v393_v40, %v312_v29 }
  0xb1   :  { %v307_v39 = vmul.f32 %v392_v32, %v301_v33 }
  0xb4   :  { %v323_v34 = vpop.permute.xlu1 %322 }
  0xb5   :  { %v329_v50 = vmul.f32 %v394_v42, %v323_v34 }
  0xb6   :  { %v345_v48 = vpop.permute.xlu0 %344 }
  0xb7   :  { %v351_v53 = vmul.f32 %v396_v47, %v345_v48 }
  0xb9   :  { %v334_v44 = vpop.permute.xlu1 %333 }
  0xba   :  { %v340_v51 = vmul.f32 %v395_v43, %v334_v44 }
 0x108   :  { %v281_v35 = vpop.f32.mrb[0].mxu0 }
 0x109   :  { %v282_v37 = vadd.f32 %v388_v31, %v281_v35  ;;  %v430_v38 = vpop.f32.mrb[1].mxu0 }
 0x10b   :  { %v297_v41 = vadd.f32 %v296_v36, %v282_v37 }
 0x10d   :  { %v308_v46 = vadd.f32 %v307_v39, %v297_v41 }
 0x10f   :  { %v319_v49 = vadd.f32 %v318_v45, %v308_v46 }
 0x111   :  { %v330_v52 = vadd.f32 %v329_v50, %v319_v49 }
 0x113   :  { %v341_v54 = vadd.f32 %v340_v51, %v330_v52 }
 0x115   :  { %v352_v55 = vadd.f32 %v351_v53, %v341_v54 }
 0x117   :  { %v353_v56 = vsel %vm208_vm11, %v352_v55, -inf }
 0x118   :  { %354 = vmax.xlane.f32.xlu1 %v353_v56 }
 0x1a5   :  { %v355_v57 = vpop.xlane.xlu1 %354 }
 0x1a6   :  { %v356_v58 = vsub.f32 %v352_v55, %v355_v57 }
 0x1a8   :  { %v357_v59 = vmul.f32 1.442695, %v356_v58 }
 0x1aa   :  { %465 = vpow2.f32 %v357_v59 }
 0x1b4   :  { %v466_v62 = vpop.eup %465 }
 0x1b5   :  { %v361_v63 = vmul.f32 %v466_v62, %v360_v61 }
 0x1b7   :  { %v362_v0 = vsel %vm208_vm11, %v361_v63, 0.0 }
 0x1b8   :  { %363 = vadd.xlane.f32.xlu0 %v362_v0 }
 0x245   :  { %v364_v1 = vpop.xlane.xlu0 %363 }
 0x246   :  { %v365_v2 = vmax.f32 %v364_v1, 1e-12 }
 0x248   :  { %467 = vrcp.f32 %v365_v2 }
 0x252   :  { %v468_v4 = vpop.eup %467 }
 0x253   :  { %v367_v3 = vmul.f32 %v468_v4, %v361_v63 }
 0x255   :  { %368 = vst.msk [vmem:[#allocation5] sm:$0xff] %vm208_vm11, %v367_v3 }
 0x256   :  { %492 = shalt.err (!%p489_p9)
}
 0x257   :  { %s493_s30 = scalar_lea.hbm %s788_s7, 128 }
 0x258   :  { %p494_p10 = scmp.ne.s32.totalorder %s788_s7, %s493_s30  ;;  %p497_p11 = scmp.lt.u32.totalorder %s493_s30, %s788_s7 }
 0x25a   :  { %p499_p12 = pnand %p497_p11, %p494_p10 }
 0x25c   :  { %502 = shalt.err (!%p499_p12)
}
 0x25d   :  { %378 = dma.vmem_to_hbm [thread:$0]  %s376_s27, 128, %s788_s7, [#allocation3]  }
 0x25e   :  { %505 = dma.done.wait [#allocation3], 128  }
 0x25f   :  { %506 = vsyncadd [#allocation3], 4294967168 }
 0x260   :  { %382 = vsyncpa [#allocation3], 1 }
 0x261   :  { %383 = vsyncpa [#allocation4], 1 }

</bundles_post_ra>
